<compile_context>
chip_gen: v6e
topology: v6e:2x2x1
jax: 0.10.0
libtpu: 0.0.40
codegen_flags: <defaults>
</compile_context>

<pallas_src>
import functools

import jax
import jax.numpy as jnp
from jax.experimental import pallas as pl
from jax.experimental.pallas import tpu as pltpu


def _l1_partial_kernel(x_ref, y_ref, part_ref, *, hw, mask_tail):
    """Accumulate per-channel sum(|x - y|) for one batch into part_ref.

    x_ref, y_ref: (1, M, T) native dtype tiles.
    part_ref:     (1, M, 1) f32, same block for all chunk steps (accumulator).
    """
    c = pl.program_id(1)

    @pl.when(c == 0)
    def _init():
        part_ref[...] = jnp.zeros_like(part_ref)

    x = x_ref[0].astype(jnp.float32)          # (M, T)
    y = y_ref[0].astype(jnp.float32)
    diff = jnp.abs(x - y)                     # VPU

    if mask_tail:
        # Last chunk may overrun HW; zero the out-of-range lanes.
        m, t = diff.shape
        col = jax.lax.broadcasted_iota(jnp.int32, (m, t), 1)
        valid = hw - c * t
        diff = jnp.where(col < valid, diff, 0.0)

    # Lane-dense reduce along the last axis (XLU), accumulate in f32.
    part_ref[...] += jnp.sum(diff, axis=1, keepdims=True)[None]


def _choose_tile(M, HW, itemsize):
    # Budget ~8 MiB for 2 inputs x 2 pipeline buffers of (M, TILE) each;
    # safe under v5e's 16 MiB default scoped VMEM and v7x's 64 MiB physical.
    budget = 8 * 1024 * 1024
    max_tile = max(128, (budget // (4 * M * itemsize)) // 128 * 128)
    if HW <= max_tile:
        return HW, False            # single full-width block, no masking
    return max_tile, (HW % max_tile) != 0


def loss_l1_pallas(x, y, weight):
    """x, y: (B, M, H, W) NCHW (any float dtype). weight: (M,) .

    Returns [l_sum, l_0, ..., l_{M-1}], matching the PyTorch module.
    """
    B, M, H, W = x.shape
    HW = H * W
    xm = x.reshape(B, M, HW)        # free reshape, no relayout
    ym = y.reshape(B, M, HW)

    itemsize = jnp.dtype(xm.dtype).itemsize
    tile, mask_tail = _choose_tile(M, HW, itemsize)
    num_chunks = pl.cdiv(HW, tile)

    kernel = functools.partial(_l1_partial_kernel, hw=HW, mask_tail=mask_tail)

    partial_sums = pl.pallas_call(
        kernel,
        out_shape=jax.ShapeDtypeStruct((B, M, 1), jnp.float32),
        grid=(B, num_chunks),
        in_specs=[
            pl.BlockSpec((1, M, tile), lambda b, c: (b, 0, c)),
            pl.BlockSpec((1, M, tile), lambda b, c: (b, 0, c)),
        ],
        out_specs=pl.BlockSpec((1, M, 1), lambda b, c: (b, 0, 0)),
        compiler_params=pltpu.CompilerParams(
            dimension_semantics=("parallel", "arbitrary"),
        ),
    )(xm, ym)

    # Tiny epilogue in plain JAX: means, weighting, weighted sum.
    chan_means = jnp.sum(partial_sums[:, :, 0], axis=0) / float(B * HW)   # (M,)
    w = jnp.asarray(weight, jnp.float32).reshape(M)
    l_sum = jnp.sum(chan_means * w)
    # Module returns a Python list [l_sum, l_0, ..., l_{M-1}].
    return [l_sum] + [chan_means[i] for i in range(M)]


if __name__ == "__main__":
    # Small deterministic example consistent with NCHW conv-style inputs.
    B, M, H, W = 2, 4, 16, 16
    key = jax.random.PRNGKey(0)
    kx, ky = jax.random.split(key)
    x = jax.random.normal(kx, (B, M, H, W), dtype=jnp.float32)
    y = jax.random.normal(ky, (B, M, H, W), dtype=jnp.float32)
    weight = jnp.array([0.1, 0.2, 0.3, 0.4], dtype=jnp.float32)

    out = loss_l1_pallas(x, y, weight)
    out = [jax.block_until_ready(o) for o in out]

    # Pure-JAX reference of the same semantics.
    ref_chan = jnp.mean(jnp.abs(x - y), axis=(0, 2, 3))          # (M,)
    ref_sum = jnp.sum(ref_chan * weight)
    ref = [ref_sum] + [ref_chan[i] for i in range(M)]
    for got, want in zip(out, ref):
        assert jnp.allclose(got, want, rtol=1e-5, atol=1e-6), (got, want)

    print("KERNEL_OK")
</pallas_src>

<mosaic_0001>
module attributes {stable_mosaic.version = 11 : i64} {
  func.func @_l1_partial_kernel(%arg0: i32, %arg1: i32, %arg2: memref<1x4x256xf32, #tpu.memory_space<vmem>>, %arg3: memref<1x4x256xf32, #tpu.memory_space<vmem>>, %arg4: memref<1x4x1xf32, #tpu.memory_space<vmem>>) attributes {dimension_semantics = [#tpu.dimension_semantics<parallel>, #tpu.dimension_semantics<arbitrary>], iteration_bounds = array<i64: 2, 1>, scalar_prefetch = 0 : i64, scratch_operands = 0 : i64, tpu.core_type = #tpu.core_type<tc>, window_params = [{transform_indices = @transform_0, window_bounds = array<i64: 1, 4, 256>}, {transform_indices = @transform_1, window_bounds = array<i64: 1, 4, 256>}, {transform_indices = @transform_2, window_bounds = array<i64: 1, 4, 1>}]} {
    %c0_i32 = arith.constant 0 : i32
    %0 = arith.cmpi eq, %arg1, %c0_i32 : i32
    %1 = arith.extui %0 : i1 to i32
    %c0_i32_0 = arith.constant 0 : i32
    %2 = arith.cmpi ne, %1, %c0_i32_0 : i32
    scf.if %2 {
      %cst_12 = arith.constant 0.000000e+00 : f32
      %15 = vector.broadcast %cst_12 : f32 to vector<1x4x1xf32>
      %c0_13 = arith.constant 0 : index
      %c0_14 = arith.constant 0 : index
      %c0_15 = arith.constant 0 : index
      %16 = vector.load %arg4[%c0_13, %c0_14, %c0_15] : memref<1x4x1xf32, #tpu.memory_space<vmem>>, vector<1x4x1xf32>
      tpu.vector_store %arg4[%c0_13, %c0_14, %c0_15], %15 {strides = array<i32>} : memref<1x4x1xf32, #tpu.memory_space<vmem>>, vector<1x4x1xf32>,
    } else {
    }
    %c0 = arith.constant 0 : index
    %c0_1 = arith.constant 0 : index
    %c0_2 = arith.constant 0 : index
    %3 = vector.load %arg2[%c0, %c0_1, %c0_2] : memref<1x4x256xf32, #tpu.memory_space<vmem>>, vector<1x4x256xf32>
    %4 = vector.shape_cast %3 : vector<1x4x256xf32> to vector<4x256xf32>
    %c0_3 = arith.constant 0 : index
    %c0_4 = arith.constant 0 : index
    %c0_5 = arith.constant 0 : index
    %5 = vector.load %arg3[%c0_3, %c0_4, %c0_5] : memref<1x4x256xf32, #tpu.memory_space<vmem>>, vector<1x4x256xf32>
    %6 = vector.shape_cast %5 : vector<1x4x256xf32> to vector<4x256xf32>
    %7 = arith.subf %4, %6 : vector<4x256xf32>
    %8 = math.absf %7 : vector<4x256xf32>
    %c0_6 = arith.constant 0 : index
    %c0_7 = arith.constant 0 : index
    %c0_8 = arith.constant 0 : index
    %9 = vector.load %arg4[%c0_6, %c0_7, %c0_8] : memref<1x4x1xf32, #tpu.memory_space<vmem>>, vector<1x4x1xf32>
    %cst = arith.constant dense<0.000000e+00> : vector<4xf32>
    %10 = vector.multi_reduction <add>, %8, %cst [1] : vector<4x256xf32> to vector<4xf32>
    %11 = vector.shape_cast %10 : vector<4xf32> to vector<4x1xf32>
    %12 = vector.shape_cast %11 : vector<4x1xf32> to vector<1x4x1xf32>
    %13 = arith.addf %9, %12 : vector<1x4x1xf32>
    %c0_9 = arith.constant 0 : index
    %c0_10 = arith.constant 0 : index
    %c0_11 = arith.constant 0 : index
    %14 = vector.load %arg4[%c0_9, %c0_10, %c0_11] : memref<1x4x1xf32, #tpu.memory_space<vmem>>, vector<1x4x1xf32>
    tpu.vector_store %arg4[%c0_9, %c0_10, %c0_11], %13 {strides = array<i32>} : memref<1x4x1xf32, #tpu.memory_space<vmem>>, vector<1x4x1xf32>,
    return
  }
  func.func @transform_0(%arg0: i32, %arg1: i32) -> (i32, i32, i32) {
    %c0_i32 = arith.constant 0 : i32
    %c0_i32_0 = arith.constant 0 : i32
    return %arg0, %c0_i32, %arg1 : i32, i32, i32
  }
  func.func @transform_1(%arg0: i32, %arg1: i32) -> (i32, i32, i32) {
    %c0_i32 = arith.constant 0 : i32
    %c0_i32_0 = arith.constant 0 : i32
    return %arg0, %c0_i32, %arg1 : i32, i32, i32
  }
  func.func @transform_2(%arg0: i32, %arg1: i32) -> (i32, i32, i32) {
    %c0_i32 = arith.constant 0 : i32
    %c0_i32_0 = arith.constant 0 : i32
    %c0_i32_1 = arith.constant 0 : i32
    return %arg0, %c0_i32, %c0_i32_0 : i32, i32, i32
  }
}

</mosaic_0001>

<bundles_post_ra>
// kernel: tpu_custom_call.1
= control target key start
LH: loop header
LB: loop body
LE: loop exit
PB: predicated region body
PF: predicated region fallthrough
CT: control target
= control target key end

     0   :  { %7 = vsyncpa [#allocation3], 0  ;;  %s682_s0 = inlined_call_operand.hbm [shape: f32[2,4,256], index: 0, kind: input, shape index: {}]   ;;  %s683_s1 = inlined_call_operand.hbm [shape: f32[2,4,256], index: 1, kind: input, shape index: {}]   ;;  %s684_s2 = inlined_call_operand.vmem [shape: f32[2,4,1], index: 2, kind: output, shape index: {}]  }
   0x1   :  { %9 = vsyncpa [#allocation3 + $0x1], 0 }
   0x2   :  { %10 = vsyncpa [#allocation5], 0 }
   0x3   :  { %12 = vsyncpa [#allocation5 + $0x1], 0  ;;  %s554_s9 = smov 0   ;;  %s556_s10 = smov 0  }
   0x4   :  { %s558_s11 = smov 0   ;;  %s560_s12 = smov 0  }
   0x5   :  { %s562_s13 = smov 0   ;;  %s564_s14 = smov 0  }
   0x6 LB: > { %s345_s15 = sadd.s32 4294967295, %s534_s14   ;;  %s30_s16 = sadd.s32 1, %s530_s13  ;;  %s534_s14 = sphi %s564_s14, %s18_s14   ;;  %s530_s13 = sphi %s562_s13, %s693_s13   ;;  %s526_s12 = sphi %s560_s12, %s692_s12   ;;  %s522_s11 = sphi %s558_s11, %s691_s11   ;;  %s518_s10 = sphi %s556_s10, %s690_s10   ;;  %s514_s9 = sphi %s554_s9, %s689_s9  }
   0x7   : > { %p32_p0 = scmp.ge.s32.totalorder %s30_s16, 2  ;;  %s39_s17 = sadd.s32 1, %s522_s11 }
   0x8   : > { %p46_p1 = scmp.ne.s32.totalorder %s522_s11, %s518_s10  ;;  %p47_p2 = scmp.eq.s32.totalorder %s534_s14, 0 }
   0x9   : > { %s695_s16 = smov (%p32_p0, %s30_s16), 0  ;;  %p52_p4 = scmp.ne.s32.totalorder %s518_s10, %s514_s9 }
   0xa   : > { %p590_p3 = por %p47_p2, %p46_p1  ;;  %s34_s19 = ssub.s32 %s530_s13, %s695_s16 }
   0xb   : > { %p53_p5 = scmp.eq.s32.totalorder %s345_s15, 0  ;;  %p37_p6 = scmp.eq.s32.totalorder %s34_s19, 0 }
   0xc   : > { %p374_p8 = scmp.lt.s32.totalorder %s534_s14, 2  ;;  %s606_s22 = sand.u32 1, %s522_s11  }
   0xd   : > { %p597_p7 = por %p53_p5, %p52_p4  ;;  %s361_s23 = sshll.u32 %s530_s13, 7 }
   0xe   : > { %s603_s21 = scalar_select %p37_p6, %s522_s11, %s39_s17  }
   0xf   : > { %s349_s24 = sshll.u32 %s606_s22, 3  ;;  %s142_s27 = scalar_lea.hbm %s682_s0, %s361_s23 }
  0x10   : > { %s134_s28 = scalar_lea.vmem [#allocation2], %s349_s24  ;;  %p615_p9 = pnand %p374_p8, %p590_p3 }
  0x11   : > { %s144_s29 = sshll.u32 %s134_s28, 4  ;;  %p355_p10 = scmp.ge.s32.totalorder %s534_s14, 1  ;;  %s145_s29 = int_to_ptr.vmem [resolvable:$true] %s144_s29 }
  0x12   : > { %p170_p11 = scmp.lt.s32.totalorder %s534_s14, 3  ;;  %s131_s3 = scalar_lea.sflag [#allocation3], %s606_s22 }
  0x13   : > { %p426_p12 = pneg %p615_p9  ;;  %s437_s4 = scalar_lea.vmem %s145_s29, 128 }
  0x14   : > { %p438_p13 = scmp.ne.s32.totalorder %s145_s29, %s437_s4  ;;  %s536_s5 = smov [#allocation2]  }
  0x15   : > { %s442_s6 = sshll.u32 %s536_s5, 4  ;;  %s443_s6 = int_to_ptr.vmem [resolvable:$false] %s442_s6 }
  0x16   : > { %p440_p0 = pnand %p438_p13, %p426_p12  ;;  %s444_s7 = scalar_lea.vmem %s443_s6, 256 }
  0x17   : > { %p445_p2 = scmp.lt.s32.totalorder %s145_s29, %s443_s6  ;;  %p446_p3 = scmp.lt.s32.totalorder %s444_s7, %s437_s4 }
  0x18   : > { %p441_p1 = pneg %p440_p0 }
  0x19   : > { %p447_p4 = por %p446_p3, %p445_p2 }
  0x1b   : > { %p448_p5 = pnand %p447_p4, %p441_p1 }
  0x1d   : > { %451 = shalt.err (!%p448_p5)
}
  0x1e   : > { %370 = dma.hbm_to_vmem [thread:$0]  (!%p615_p9), %s142_s27, 128, %s145_s29, %s131_s3  }
  0x1f   : > { %p633_p6 = pnand %p355_p10, %p170_p11  ;;  %s163_s17 = scalar_lea.hbm %s683_s1, %s361_s23 }
  0x20   : > { %s155_s18 = scalar_lea.vmem [#allocation4], %s349_s24  ;;  %s152_s25 = scalar_lea.sflag [#allocation5], %s606_s22 }
  0x21   : > { %s165_s19 = sshll.u32 %s155_s18, 4  ;;  %s537_s27 = smov [#allocation4]   ;;  %s166_s19 = int_to_ptr.vmem [resolvable:$true] %s165_s19 }
  0x22   : > { %s465_s26 = scalar_lea.vmem %s166_s19, 128  ;;  %s470_s28 = sshll.u32 %s537_s27, 4  ;;  %s471_s28 = int_to_ptr.vmem [resolvable:$false] %s470_s28 }
  0x23   : > { %p466_p8 = scmp.ne.s32.totalorder %s166_s19, %s465_s26  ;;  %s472_s29 = scalar_lea.vmem %s471_s28, 256 }
  0x24   : > { %p473_p10 = scmp.lt.s32.totalorder %s166_s19, %s471_s28  ;;  %p474_p11 = scmp.lt.s32.totalorder %s472_s29, %s465_s26 }
  0x25   : > { %p468_p13 = pnand %p466_p8, %p426_p12 }
  0x26   : > { %p475_p1 = por %p474_p11, %p473_p10 }
  0x27   : > { %p469_p0 = pneg %p468_p13 }
  0x29   : > { %p476_p2 = pnand %p475_p1, %p469_p0 }
  0x2b   : > { %479 = shalt.err (!%p476_p2)
}
  0x2c   : > { %373 = dma.hbm_to_vmem [thread:$0]  (!%p615_p9), %s163_s17, 128, %s166_s19, %s152_s25  }
  0x2d   : > { %174 = sbr.rel (%p633_p6) target bundleno = 204 (0xcc), region = 28  ;;  %s176_s22 = sand.u32 (!%p633_p6), 1, %s518_s10  }
  0x2e   : > { %s356_s23 = sshll.u32 (!%p633_p6), %s176_s22, 3  ;;  %s177_s24 = scalar_lea.sflag (!%p633_p6), [#allocation3], %s176_s22 }
  0x2f   : > { %s180_s3 = scalar_lea.vmem (!%p633_p6), [#allocation2], %s356_s23 }
  0x32   : > { %505 = dma.done.wait (%p597_p7), %s177_s24, 128  }
  0x33   : > { %507 = vsyncadd (%p597_p7), %s177_s24, 4294967168  ;;  %s186_s4 = scalar_lea.sflag [#allocation5], %s176_s22  ;;  %s189_s5 = scalar_lea.vmem [#allocation4], %s356_s23 }
  0x34   : > { %509 = dma.done.wait (%p597_p7), %s186_s4, 128  }
  0x35   : > { %511 = vsyncadd (%p597_p7), %s186_s4, 4294967168  ;;  %p216_p9 = scmp.lt.s32.totalorder %s526_s12, 1  ;;  %vm224_vm0 = vcmask 3072   ;;  %v538_v0 = vmov 0.0   ;;  %v226_v1 = vld [vmem:[%s180_s3] sm:$0xff]  ;;  %v227_v2 = vld [vmem:[%s189_s5] sm:$0xff] }
  0x36   : > { %v228_v3 = vsub.f32 %v226_v1, %v227_v2  ;;  %vm234_vm1 = vcmask 1043456  }
  0x37   : > { %s697_s12 = smov (!%p216_p9, %s526_s12), 1 }
  0x38   : > { %s358_s30 = sshll.u32 %s697_s12, 2  ;;  %v229_v4 = vand.u32 2147483647, %v228_v3 }
  0x39   : > { %s219_s8 = scalar_lea.vmem %s684_s2, %s358_s30 }
  0x3a   : > { %225 = vst.msk [vmem:[%s219_s8] sm:$0xf] %vm224_vm0, %v538_v0  ;;  %v232_v5 = vcombine.high %v229_v4, %v229_v4  ;;  %v235_v6 = vsel %vm234_vm1, %v229_v4, 0.0 }
  0x3c   : > { %v236_v7 = vsel %vm234_vm1, %v232_v5, 0.0 }
  0x3d   : > { %v237_v8 = vadd.f32 %v236_v7, %v235_v6 }
  0x3f   : > { %238 = vadd.xlane.f32.xlu0 %v237_v8 }
  0x41   : > { %v230_v9 = vld [vmem:[%s219_s8] sm:$0xf] }
  0xc8   : > { %v239_v10 = vpop.xlane.xlu0 %238 }
  0xc9   : > { %v240_v11 = vadd.f32 %v239_v10, %v230_v9 }
  0xcb   : > { %242 = vst.msk [vmem:[%s219_s8] sm:$0xf] %vm224_vm0, %v240_v11 }
  0xcc PF: > { %s18_s14 = sadd.s32 1, %s534_s14   ;;  %s689_s9 = smov %s518_s10 }
  0xcd   : > { %p15_p7 = scmp.ge.s32.totalorder %s18_s14, 4   ;;  %s690_s10 = smov %s522_s11 }
  0xce   : > { %s691_s11 = smov %s603_s21  ;;  %s692_s12 = smov %s530_s13 }
  0xcf   : > { %s693_s13 = smov %s695_s16  ;;  %17 = sbr.rel (!%p15_p7) target bundleno = 6 (0x6), region = 85 }
  0xd4   :  { %262 = vsyncpa [#allocation3], 1 }
  0xd5   :  { %264 = vsyncpa [#allocation3 + $0x1], 1 }
  0xd6   :  { %265 = vsyncpa [#allocation5], 1 }
  0xd7   :  { %267 = vsyncpa [#allocation5 + $0x1], 1 }

</bundles_post_ra>
